<compile_context>
chip_gen: v7x
topology: tpu7x:2x2x1
jax: 0.10.0
libtpu: 0.0.40
codegen_flags: <defaults>
</compile_context>

<pallas_src>
import functools

import jax
import jax.numpy as jnp
from jax.experimental import pallas as pl
from jax.experimental.pallas import tpu as pltpu


def _recip(x):
    """EUP approximate reciprocal refined with two Newton-Raphson steps (~f32 accurate)."""
    r = pl.reciprocal(x, approx=True)
    r = r * (2.0 - x * r)
    r = r * (2.0 - x * r)
    return r


def fusion_kernel(x_ref, w_ref, b_ref, out_ref, *, num_views, num_classes, out_width):
    """x_ref: (B, V*D)   w_ref: (V*D, V*K) block-diagonal   b_ref: (1, V*K)
       out_ref: (B, out_width) packed as [alphas | alpha_comb | u_list | u_a | pad]."""
    V, K = num_views, num_classes
    Kf = float(K)
    B = x_ref.shape[0]

    # One fused lane-dense matmul for all V per-view classifiers (single MXU pass).
    logits = jnp.dot(x_ref[...], w_ref[...],
                     preferred_element_type=jnp.float32) + b_ref[...]
    evidence = jnp.maximum(logits, 0.0)        # Dropout(0.5) in eval mode == identity
    alpha_slab = evidence + 1.0                # (B, V*K), lane-dense

    # Per-view Dirichlet -> (belief, uncertainty).  S_v computed once and reused.
    items = []
    u_cols = []
    for v in range(V):
        ev_v = evidence[:, v * K:(v + 1) * K]                # == alpha_v - 1
        S_v = jnp.sum(ev_v, axis=1, keepdims=True) + Kf      # == sum(alpha_v)
        inv_S = _recip(S_v)
        b_v = ev_v * inv_S
        u_v = Kf * inv_S
        items.append((b_v, u_v))
        u_cols.append(u_v)

    def combine(p, q):
        b1, u1 = p
        b2, u2 = q
        # C = sum_{i != j} b1_i * b2_j = sum(b1)*sum(b2) - sum(b1*b2)
        C = (jnp.sum(b1, axis=1, keepdims=True) * jnp.sum(b2, axis=1, keepdims=True)
             - jnp.sum(b1 * b2, axis=1, keepdims=True))
        inv_denom = _recip(1.0 - C)
        b = (b1 * b2 + b1 * u2 + b2 * u1) * inv_denom
        u = (u1 * u2) * inv_denom
        return b, u

    # Balanced binary-tree DS combination (Dempster's rule is associative).
    while len(items) > 1:
        nxt = [combine(items[i], items[i + 1]) for i in range(0, len(items) - 1, 2)]
        if len(items) % 2 == 1:
            nxt.append(items[-1])
        items = nxt
    b_a, u_a = items[0]

    S_a = Kf * _recip(u_a)                    # sum(alpha_a) == K / u_a for DS-combined masses
    alpha_comb = b_a * S_a + 1.0              # (B, K)

    u_mat = jnp.concatenate(u_cols, axis=1) if V > 1 else u_cols[0]   # (B, V)
    pieces = [alpha_slab, alpha_comb, u_mat, u_a]
    used = V * K + K + V + 1
    pad = out_width - used
    if pad > 0:
        pieces.append(jnp.zeros((B, pad), jnp.float32))
    out_ref[...] = jnp.concatenate(pieces, axis=1).astype(out_ref.dtype)   # single store


def multi_view_ds_fusion(views, weights, biases, num_classes):
    """views: (V,B,D) f32, weights: (V,D,K) f32, biases: (V,1,K) f32.
       Returns (alphas (V,B,K), alpha_combined (B,K), u_a (B,1), u_list (V,B,1))."""
    V, B, D = views.shape
    K = num_classes

    # Lane-dense fused operands: x -> (B, V*D), block-diagonal W -> (V*D, V*K), bias -> (1, V*K).
    x_flat = jnp.transpose(views, (1, 0, 2)).reshape(B, V * D)
    w_bd = jnp.zeros((V * D, V * K), weights.dtype)
    for v in range(V):
        w_bd = w_bd.at[v * D:(v + 1) * D, v * K:(v + 1) * K].set(weights[v])
    b_flat = biases.reshape(1, V * K)

    used = V * K + K + V + 1
    out_w = max(128, ((used + 127) // 128) * 128)   # lane-dense output slab width

    kernel = functools.partial(fusion_kernel, num_views=V, num_classes=K, out_width=out_w)
    vmem = pl.BlockSpec(memory_space=pltpu.MemorySpace.VMEM)

    # TODO(synk): for large B add a batch grid (BlockSpec((TB, V*D), lambda i: (i, 0)), TB a
    #             multiple of 8, dimension_semantics=("parallel",)), sized against v7x's 64 MiB
    #             VMEM; at these toy sizes the whole problem fits in one VMEM-resident block.
    packed = pl.pallas_call(
        kernel,
        out_shape=jax.ShapeDtypeStruct((B, out_w), jnp.float32),
        in_specs=[vmem, vmem, vmem],
        out_specs=vmem,
    )(x_flat, w_bd, b_flat)

    alphas = packed[:, :V * K].reshape(B, V, K).transpose(1, 0, 2)      # (V, B, K)
    alpha_comb = packed[:, V * K:V * K + K]                             # (B, K)
    u_list = packed[:, V * K + K:V * K + K + V].T[:, :, None]           # (V, B, 1)
    u_a = packed[:, V * K + K + V:V * K + K + V + 1]                    # (B, 1)
    return alphas, alpha_comb, u_a, u_list


# ----------------------- pure-JAX reference (faithful to the PyTorch code) ------------------

def _ds_combine_two_ref(a1, a2, K):
    S1 = jnp.sum(a1, axis=1, keepdims=True)
    S2 = jnp.sum(a2, axis=1, keepdims=True)
    b1 = (a1 - 1.0) / S1
    b2 = (a2 - 1.0) / S2
    u1 = K / S1
    u2 = K / S2
    C = (jnp.sum(b1, axis=1, keepdims=True) * jnp.sum(b2, axis=1, keepdims=True)
         - jnp.sum(b1 * b2, axis=1, keepdims=True))
    denom = 1.0 - C
    b_a = (b1 * b2 + b1 * u2 + b2 * u1) / denom
    u_a = (u1 * u2) / denom
    S_a = K / u_a
    alpha_a = b_a * S_a + 1.0
    return alpha_a, u_a


def reference(views, weights, biases, num_classes):
    V = views.shape[0]
    K = float(num_classes)
    alphas, u_list = [], []
    for v in range(V):
        ev = jnp.maximum(views[v] @ weights[v] + biases[v], 0.0)
        a = ev + 1.0
        alphas.append(a)
        u_list.append(K / jnp.sum(a, axis=1, keepdims=True))
    alpha_a, u_a = _ds_combine_two_ref(alphas[0], alphas[1], K)
    for v in range(2, V):
        alpha_a, u_a = _ds_combine_two_ref(alpha_a, alphas[v], K)
    return jnp.stack(alphas), alpha_a, u_a, jnp.stack(u_list)


if __name__ == "__main__":
    num_views, feature_dim, num_classes, batch = 3, 32, 8, 4

    key = jax.random.PRNGKey(0)
    k_views, k_w, k_b = jax.random.split(key, 3)

    views = jax.random.normal(k_views, (num_views, batch, feature_dim), dtype=jnp.float32)
    # PyTorch Linear default init scale ~ U(-1/sqrt(D), 1/sqrt(D)).
    lim = 1.0 / (feature_dim ** 0.5)
    weights = jax.random.uniform(k_w, (num_views, feature_dim, num_classes),
                                 minval=-lim, maxval=lim, dtype=jnp.float32)
    biases = jax.random.uniform(k_b, (num_views, 1, num_classes),
                                minval=-lim, maxval=lim, dtype=jnp.float32)

    alphas, alpha_comb, u_a, u_list = jax.block_until_ready(
        multi_view_ds_fusion(views, weights, biases, num_classes))

    ref_alphas, ref_comb, ref_ua, ref_ulist = reference(views, weights, biases, num_classes)
    assert jnp.allclose(alphas, ref_alphas, atol=1e-5, rtol=1e-5)
    assert jnp.allclose(alpha_comb, ref_comb, atol=1e-4, rtol=1e-4)
    assert jnp.allclose(u_a, ref_ua, atol=1e-5, rtol=1e-5)
    assert jnp.allclose(u_list, ref_ulist, atol=1e-5, rtol=1e-5)

    print("KERNEL_OK")
</pallas_src>

<mosaic_0001>
module attributes {stable_mosaic.version = 11 : i64} {
  func.func @fusion_kernel(%arg0: memref<4x96xf32, #tpu.memory_space<vmem>>, %arg1: memref<96x24xf32, #tpu.memory_space<vmem>>, %arg2: memref<1x24xf32, #tpu.memory_space<vmem>>, %arg3: memref<4x128xf32, #tpu.memory_space<vmem>>) attributes {dimension_semantics = [], scalar_prefetch = 0 : i64, scratch_operands = 0 : i64, tpu.core_type = #tpu.core_type<tc>} {
    %c0 = arith.constant 0 : index
    %c0_0 = arith.constant 0 : index
    %0 = vector.load %arg0[%c0, %c0_0] : memref<4x96xf32, #tpu.memory_space<vmem>>, vector<4x96xf32>
    %c0_1 = arith.constant 0 : index
    %c0_2 = arith.constant 0 : index
    %1 = vector.load %arg1[%c0_1, %c0_2] : memref<96x24xf32, #tpu.memory_space<vmem>>, vector<96x24xf32>
    %cst = arith.constant dense<0.000000e+00> : vector<4x24xf32>
    %2 = tpu.matmul %0, %1, %cst {dimension_numbers = #tpu.dot_dimension_numbers<[1], [0], [0], [1], [0, 0, 1, 1], [], []>} : vector<4x96xf32>, vector<96x24xf32>, vector<4x24xf32> -> vector<4x24xf32>
    %c0_3 = arith.constant 0 : index
    %c0_4 = arith.constant 0 : index
    %3 = vector.load %arg2[%c0_3, %c0_4] : memref<1x24xf32, #tpu.memory_space<vmem>>, vector<1x24xf32>
    %4 = vector.broadcast %3 : vector<1x24xf32> to vector<4x24xf32>
    %5 = arith.addf %2, %4 : vector<4x24xf32>
    %cst_5 = arith.constant 0.000000e+00 : f32
    %6 = vector.broadcast %cst_5 : f32 to vector<4x24xf32>
    %7 = arith.maximumf %5, %6 : vector<4x24xf32>
    %cst_6 = arith.constant 1.000000e+00 : f32
    %8 = vector.broadcast %cst_6 : f32 to vector<4x24xf32>
    %9 = arith.addf %7, %8 : vector<4x24xf32>
    %10 = vector.extract_strided_slice %7 {offsets = [0, 0], sizes = [4, 8], strides = [1, 1]} : vector<4x24xf32> to vector<4x8xf32>
    %cst_7 = arith.constant dense<0.000000e+00> : vector<4xf32>
    %11 = vector.multi_reduction <add>, %10, %cst_7 [1] : vector<4x8xf32> to vector<4xf32>
    %12 = vector.shape_cast %11 : vector<4xf32> to vector<4x1xf32>
    %cst_8 = arith.constant 8.000000e+00 : f32
    %13 = vector.broadcast %cst_8 : f32 to vector<4x1xf32>
    %14 = arith.addf %12, %13 : vector<4x1xf32>
    %15 = tpu.reciprocal %14 {approx = true} : vector<4x1xf32> -> vector<4x1xf32>
    %16 = arith.mulf %14, %15 : vector<4x1xf32>
    %cst_9 = arith.constant 2.000000e+00 : f32
    %17 = vector.broadcast %cst_9 : f32 to vector<4x1xf32>
    %18 = arith.subf %17, %16 : vector<4x1xf32>
    %19 = arith.mulf %15, %18 : vector<4x1xf32>
    %20 = arith.mulf %14, %19 : vector<4x1xf32>
    %cst_10 = arith.constant 2.000000e+00 : f32
    %21 = vector.broadcast %cst_10 : f32 to vector<4x1xf32>
    %22 = arith.subf %21, %20 : vector<4x1xf32>
    %23 = arith.mulf %19, %22 : vector<4x1xf32>
    %24 = vector.broadcast %23 : vector<4x1xf32> to vector<4x8xf32>
    %25 = arith.mulf %10, %24 : vector<4x8xf32>
    %cst_11 = arith.constant 8.000000e+00 : f32
    %26 = vector.broadcast %cst_11 : f32 to vector<4x1xf32>
    %27 = arith.mulf %26, %23 : vector<4x1xf32>
    %28 = vector.extract_strided_slice %7 {offsets = [0, 8], sizes = [4, 8], strides = [1, 1]} : vector<4x24xf32> to vector<4x8xf32>
    %cst_12 = arith.constant dense<0.000000e+00> : vector<4xf32>
    %29 = vector.multi_reduction <add>, %28, %cst_12 [1] : vector<4x8xf32> to vector<4xf32>
    %30 = vector.shape_cast %29 : vector<4xf32> to vector<4x1xf32>
    %cst_13 = arith.constant 8.000000e+00 : f32
    %31 = vector.broadcast %cst_13 : f32 to vector<4x1xf32>
    %32 = arith.addf %30, %31 : vector<4x1xf32>
    %33 = tpu.reciprocal %32 {approx = true} : vector<4x1xf32> -> vector<4x1xf32>
    %34 = arith.mulf %32, %33 : vector<4x1xf32>
    %cst_14 = arith.constant 2.000000e+00 : f32
    %35 = vector.broadcast %cst_14 : f32 to vector<4x1xf32>
    %36 = arith.subf %35, %34 : vector<4x1xf32>
    %37 = arith.mulf %33, %36 : vector<4x1xf32>
    %38 = arith.mulf %32, %37 : vector<4x1xf32>
    %cst_15 = arith.constant 2.000000e+00 : f32
    %39 = vector.broadcast %cst_15 : f32 to vector<4x1xf32>
    %40 = arith.subf %39, %38 : vector<4x1xf32>
    %41 = arith.mulf %37, %40 : vector<4x1xf32>
    %42 = vector.broadcast %41 : vector<4x1xf32> to vector<4x8xf32>
    %43 = arith.mulf %28, %42 : vector<4x8xf32>
    %cst_16 = arith.constant 8.000000e+00 : f32
    %44 = vector.broadcast %cst_16 : f32 to vector<4x1xf32>
    %45 = arith.mulf %44, %41 : vector<4x1xf32>
    %46 = vector.extract_strided_slice %7 {offsets = [0, 16], sizes = [4, 8], strides = [1, 1]} : vector<4x24xf32> to vector<4x8xf32>
    %cst_17 = arith.constant dense<0.000000e+00> : vector<4xf32>
    %47 = vector.multi_reduction <add>, %46, %cst_17 [1] : vector<4x8xf32> to vector<4xf32>
    %48 = vector.shape_cast %47 : vector<4xf32> to vector<4x1xf32>
    %cst_18 = arith.constant 8.000000e+00 : f32
    %49 = vector.broadcast %cst_18 : f32 to vector<4x1xf32>
    %50 = arith.addf %48, %49 : vector<4x1xf32>
    %51 = tpu.reciprocal %50 {approx = true} : vector<4x1xf32> -> vector<4x1xf32>
    %52 = arith.mulf %50, %51 : vector<4x1xf32>
    %cst_19 = arith.constant 2.000000e+00 : f32
    %53 = vector.broadcast %cst_19 : f32 to vector<4x1xf32>
    %54 = arith.subf %53, %52 : vector<4x1xf32>
    %55 = arith.mulf %51, %54 : vector<4x1xf32>
    %56 = arith.mulf %50, %55 : vector<4x1xf32>
    %cst_20 = arith.constant 2.000000e+00 : f32
    %57 = vector.broadcast %cst_20 : f32 to vector<4x1xf32>
    %58 = arith.subf %57, %56 : vector<4x1xf32>
    %59 = arith.mulf %55, %58 : vector<4x1xf32>
    %60 = vector.broadcast %59 : vector<4x1xf32> to vector<4x8xf32>
    %61 = arith.mulf %46, %60 : vector<4x8xf32>
    %cst_21 = arith.constant 8.000000e+00 : f32
    %62 = vector.broadcast %cst_21 : f32 to vector<4x1xf32>
    %63 = arith.mulf %62, %59 : vector<4x1xf32>
    %cst_22 = arith.constant dense<0.000000e+00> : vector<4xf32>
    %64 = vector.multi_reduction <add>, %25, %cst_22 [1] : vector<4x8xf32> to vector<4xf32>
    %65 = vector.shape_cast %64 : vector<4xf32> to vector<4x1xf32>
    %cst_23 = arith.constant dense<0.000000e+00> : vector<4xf32>
    %66 = vector.multi_reduction <add>, %43, %cst_23 [1] : vector<4x8xf32> to vector<4xf32>
    %67 = vector.shape_cast %66 : vector<4xf32> to vector<4x1xf32>
    %68 = arith.mulf %65, %67 : vector<4x1xf32>
    %69 = arith.mulf %25, %43 : vector<4x8xf32>
    %cst_24 = arith.constant dense<0.000000e+00> : vector<4xf32>
    %70 = vector.multi_reduction <add>, %69, %cst_24 [1] : vector<4x8xf32> to vector<4xf32>
    %71 = vector.shape_cast %70 : vector<4xf32> to vector<4x1xf32>
    %72 = arith.subf %68, %71 : vector<4x1xf32>
    %cst_25 = arith.constant 1.000000e+00 : f32
    %73 = vector.broadcast %cst_25 : f32 to vector<4x1xf32>
    %74 = arith.subf %73, %72 : vector<4x1xf32>
    %75 = tpu.reciprocal %74 {approx = true} : vector<4x1xf32> -> vector<4x1xf32>
    %76 = arith.mulf %74, %75 : vector<4x1xf32>
    %cst_26 = arith.constant 2.000000e+00 : f32
    %77 = vector.broadcast %cst_26 : f32 to vector<4x1xf32>
    %78 = arith.subf %77, %76 : vector<4x1xf32>
    %79 = arith.mulf %75, %78 : vector<4x1xf32>
    %80 = arith.mulf %74, %79 : vector<4x1xf32>
    %cst_27 = arith.constant 2.000000e+00 : f32
    %81 = vector.broadcast %cst_27 : f32 to vector<4x1xf32>
    %82 = arith.subf %81, %80 : vector<4x1xf32>
    %83 = arith.mulf %79, %82 : vector<4x1xf32>
    %84 = arith.mulf %25, %43 : vector<4x8xf32>
    %85 = vector.broadcast %45 : vector<4x1xf32> to vector<4x8xf32>
    %86 = arith.mulf %25, %85 : vector<4x8xf32>
    %87 = arith.addf %84, %86 : vector<4x8xf32>
    %88 = vector.broadcast %27 : vector<4x1xf32> to vector<4x8xf32>
    %89 = arith.mulf %43, %88 : vector<4x8xf32>
    %90 = arith.addf %87, %89 : vector<4x8xf32>
    %91 = vector.broadcast %83 : vector<4x1xf32> to vector<4x8xf32>
    %92 = arith.mulf %90, %91 : vector<4x8xf32>
    %93 = arith.mulf %27, %45 : vector<4x1xf32>
    %94 = arith.mulf %93, %83 : vector<4x1xf32>
    %cst_28 = arith.constant dense<0.000000e+00> : vector<4xf32>
    %95 = vector.multi_reduction <add>, %92, %cst_28 [1] : vector<4x8xf32> to vector<4xf32>
    %96 = vector.shape_cast %95 : vector<4xf32> to vector<4x1xf32>
    %cst_29 = arith.constant dense<0.000000e+00> : vector<4xf32>
    %97 = vector.multi_reduction <add>, %61, %cst_29 [1] : vector<4x8xf32> to vector<4xf32>
    %98 = vector.shape_cast %97 : vector<4xf32> to vector<4x1xf32>
    %99 = arith.mulf %96, %98 : vector<4x1xf32>
    %100 = arith.mulf %92, %61 : vector<4x8xf32>
    %cst_30 = arith.constant dense<0.000000e+00> : vector<4xf32>
    %101 = vector.multi_reduction <add>, %100, %cst_30 [1] : vector<4x8xf32> to vector<4xf32>
    %102 = vector.shape_cast %101 : vector<4xf32> to vector<4x1xf32>
    %103 = arith.subf %99, %102 : vector<4x1xf32>
    %cst_31 = arith.constant 1.000000e+00 : f32
    %104 = vector.broadcast %cst_31 : f32 to vector<4x1xf32>
    %105 = arith.subf %104, %103 : vector<4x1xf32>
    %106 = tpu.reciprocal %105 {approx = true} : vector<4x1xf32> -> vector<4x1xf32>
    %107 = arith.mulf %105, %106 : vector<4x1xf32>
    %cst_32 = arith.constant 2.000000e+00 : f32
    %108 = vector.broadcast %cst_32 : f32 to vector<4x1xf32>
    %109 = arith.subf %108, %107 : vector<4x1xf32>
    %110 = arith.mulf %106, %109 : vector<4x1xf32>
    %111 = arith.mulf %105, %110 : vector<4x1xf32>
    %cst_33 = arith.constant 2.000000e+00 : f32
    %112 = vector.broadcast %cst_33 : f32 to vector<4x1xf32>
    %113 = arith.subf %112, %111 : vector<4x1xf32>
    %114 = arith.mulf %110, %113 : vector<4x1xf32>
    %115 = arith.mulf %92, %61 : vector<4x8xf32>
    %116 = vector.broadcast %63 : vector<4x1xf32> to vector<4x8xf32>
    %117 = arith.mulf %92, %116 : vector<4x8xf32>
    %118 = arith.addf %115, %117 : vector<4x8xf32>
    %119 = vector.broadcast %94 : vector<4x1xf32> to vector<4x8xf32>
    %120 = arith.mulf %61, %119 : vector<4x8xf32>
    %121 = arith.addf %118, %120 : vector<4x8xf32>
    %122 = vector.broadcast %114 : vector<4x1xf32> to vector<4x8xf32>
    %123 = arith.mulf %121, %122 : vector<4x8xf32>
    %124 = arith.mulf %94, %63 : vector<4x1xf32>
    %125 = arith.mulf %124, %114 : vector<4x1xf32>
    %126 = tpu.reciprocal %125 {approx = true} : vector<4x1xf32> -> vector<4x1xf32>
    %127 = arith.mulf %125, %126 : vector<4x1xf32>
    %cst_34 = arith.constant 2.000000e+00 : f32
    %128 = vector.broadcast %cst_34 : f32 to vector<4x1xf32>
    %129 = arith.subf %128, %127 : vector<4x1xf32>
    %130 = arith.mulf %126, %129 : vector<4x1xf32>
    %131 = arith.mulf %125, %130 : vector<4x1xf32>
    %cst_35 = arith.constant 2.000000e+00 : f32
    %132 = vector.broadcast %cst_35 : f32 to vector<4x1xf32>
    %133 = arith.subf %132, %131 : vector<4x1xf32>
    %134 = arith.mulf %130, %133 : vector<4x1xf32>
    %cst_36 = arith.constant 8.000000e+00 : f32
    %135 = vector.broadcast %cst_36 : f32 to vector<4x1xf32>
    %136 = arith.mulf %135, %134 : vector<4x1xf32>
    %137 = vector.broadcast %136 : vector<4x1xf32> to vector<4x8xf32>
    %138 = arith.mulf %123, %137 : vector<4x8xf32>
    %cst_37 = arith.constant 1.000000e+00 : f32
    %139 = vector.broadcast %cst_37 : f32 to vector<4x8xf32>
    %140 = arith.addf %138, %139 : vector<4x8xf32>
    %141 = tpu.concatenate %27, %45, %63 in 1 : vector<4x1xf32>, vector<4x1xf32>, vector<4x1xf32> -> vector<4x3xf32>
    %cst_38 = arith.constant 0.000000e+00 : f32
    %142 = vector.broadcast %cst_38 : f32 to vector<4x92xf32>
    %143 = tpu.concatenate %9, %140, %141, %125, %142 in 1 : vector<4x24xf32>, vector<4x8xf32>, vector<4x3xf32>, vector<4x1xf32>, vector<4x92xf32> -> vector<4x128xf32>
    %c0_39 = arith.constant 0 : index
    %c0_40 = arith.constant 0 : index
    %144 = vector.load %arg3[%c0_39, %c0_40] : memref<4x128xf32, #tpu.memory_space<vmem>>, vector<4x128xf32>
    tpu.vector_store %arg3[%c0_39, %c0_40], %143 {strides = array<i32>} : memref<4x128xf32, #tpu.memory_space<vmem>>, vector<4x128xf32>,
    return
  }
}

</mosaic_0001>

<bundles_post_ra>
// kernel: tpu_custom_call.1
= control target key start
LH: loop header
LB: loop body
LE: loop exit
PB: predicated region body
PF: predicated region fallthrough
CT: control target
= control target key end

     0   :  { %v377_v3 = vmov 0.0|0.0   ;;  %vm378_vm0 = vmmov 0   ;;  %v379_v6 = vmov 0.0   ;;  %s483_s0 = inlined_call_operand.vmem [shape: f32[4,96], index: 0, kind: input, shape index: {}]   ;;  %s484_s1 = inlined_call_operand.vmem [shape: f32[96,24], index: 1, kind: input, shape index: {}]   ;;  %s485_s2 = inlined_call_operand.vmem [shape: f32[1,24], index: 2, kind: input, shape index: {}]   ;;  %s486_s3 = inlined_call_operand.hbm [shape: f32[4,128], index: 3, kind: output, shape index: {}]  }
   0x1   :  { %v16_v0 = vld [vmem:[%s484_s1] sm:$0xff]  ;;  %v17_v1 = vld [vmem:[%s484_s1 + $0x8] sm:$0xff]  ;;  %v18_v2 = vld [vmem:[%s484_s1 + $0x10] sm:$0xff]  ;;  %315 = vmatprep.subr.bf16.mxu0 %v377_v3  ;;  %312 = vmatprep.mubr.msk.f32.mxu0 %vm378_vm0, %v379_v6 }
   0x2   :  { %v316_v4 = vpack.c.bf16 %v17_v1, %v16_v0  ;;  %v19_v5 = vld [vmem:[%s484_s1 + $0x18] sm:$0xff]  ;;  %v20_v8 = vld [vmem:[%s484_s1 + $0x20] sm:$0xff]  ;;  %v21_v9 = vld [vmem:[%s484_s1 + $0x28] sm:$0xff] }
   0x3   :  { %v319_v7 = vpack.c.bf16 %v19_v5, %v18_v2 }
   0x4   :  { %317 = vmatpush3.bf16.msra.mxu0 %v316_v4 }
   0x5   :  { %318 = vmatprep.subr.bf16.mxu0 %v377_v3 }
   0x6   :  { %8 = vsyncpa [#allocation3], 0  ;;  %v322_v10 = vpack.c.bf16 %v21_v9, %v20_v8  ;;  %v22_v11 = vld [vmem:[%s484_s1 + $0x30] sm:$0xff]  ;;  %v23_v12 = vld [vmem:[%s484_s1 + $0x38] sm:$0xff]  ;;  %vm35_vm1 = vcmask 785408   ;;  %s381_s13 = smov 120  }
   0x7   :  { %v325_v13 = vpack.c.bf16 %v23_v12, %v22_v11  ;;  %v24_v14 = vld [vmem:[%s484_s1 + $0x40] sm:$0xff]  ;;  %v25_v15 = vld [vmem:[%s484_s1 + $0x48] sm:$0xff]  ;;  %v26_v17 = vld [vmem:[%s484_s1 + $0x50] sm:$0xff]  ;;  %vm111_vm2 = vcmask 60416   ;;  %vm238_vm3 = vcmask 7168   ;;  %vm240_vm4 = vcmask 15360  }
   0x8   :  { %320 = vmatpush3.bf16.msra.mxu0 %v319_v7  ;;  %v328_v16 = vpack.c.bf16 %v25_v15, %v24_v14  ;;  %v27_v18 = vld [vmem:[%s484_s1 + $0x58] sm:$0xff]  ;;  %v15_v20 = vld [vmem:[%s483_s0] sm:$0xf]  ;;  %s380_s1 = smov 112   ;;  %s382_s0 = smov 32   ;;  %vm250_vm5 = vcmask 195584  }
   0x9   :  { %321 = vmatprep.subr.bf16.mxu0 %v377_v3  ;;  %v331_v19 = vpack.c.bf16 %v27_v18, %v26_v17  ;;  %v273_v21 = vld [vmem:[%s485_s2] ss:$0 sm:$0xff]  ;;  %s383_s2 = smov 24   ;;  %vm252_vm6 = vcmask 261120   ;;  %vm254_vm7 = vcmask 285696   ;;  %s384_s14 = smov [#allocation2]  }
   0xa   :  { %s265_s15 = sshll.u32 %s384_s14, 4  ;;  %vm256_vm8 = vcmask 293888   ;;  %s266_s15 = int_to_ptr.vmem [resolvable:$true] %s265_s15 }
   0xb   :  { %s353_s16 = scalar_lea.vmem %s266_s15, 64  ;;  %p358_p1 = scmp.lt.s32.totalorder %s266_s15, %s266_s15 }
   0xc   :  { %323 = vmatpush3.bf16.msra.mxu0 %v322_v10  ;;  %p354_p0 = scmp.ne.s32.totalorder %s266_s15, %s353_s16  ;;  %p359_p2 = scmp.lt.s32.totalorder %s353_s16, %s353_s16 }
   0xd   :  { %324 = vmatprep.subr.bf16.mxu0 %v377_v3 }
   0xe   :  { %p360_p3 = por %p359_p2, %p358_p1 }
  0x10   :  { %326 = vmatpush3.bf16.msra.mxu0 %v325_v13  ;;  %p361_p4 = pnand %p360_p3, %p354_p0 }
  0x11   :  { %327 = vmatprep.subr.bf16.mxu0 %v377_v3 }
  0x14   :  { %329 = vmatpush3.bf16.msra.mxu0 %v328_v16 }
  0x15   :  { %330 = vmatprep.subr.bf16.mxu0 %v377_v3 }
  0x18   :  { %332 = vmatpush3.bf16.msra.mxu0 %v331_v19 }
  0x1b   :  { %313 = vmatmul.mubr.msk.f32.vlgmr.msra.gmra.mrb[0].mxu0 %vm35_vm1, %v15_v20 }
  0xee   :  { %v105_v22 = vpop.f32.mrb[0].mxu0 }
  0xef   :  { %v106_v23 = vadd.f32 %v273_v21, %v105_v22  ;;  %v314_v24 = vpop.f32.mrb[1].mxu0 }
  0xf1   :  { %v447_v25 = vmax.f32 %v106_v23, 0.0 }
  0xf3   :  { %142 = vrot.lane.b32.xlu1 %v447_v25, %s380_s1  ;;  %126 = vrot.lane.b32.xlu0 %v447_v25, %s381_s13  ;;  %v112_v26 = vsel %vm111_vm2, %v447_v25, 0.0 }
 0x117   :  { %113 = vadd.xlane.f32.xlu1 %v112_v26 }
 0x165   :  { %v143_v27 = vpop.permute.xlu1 %142  ;;  %v127_v28 = vpop.permute.xlu0 %126 }
 0x166   :  { %v129_v29 = vsel %vm111_vm2, %v127_v28, 0.0  ;;  %v145_v30 = vsel %vm111_vm2, %v143_v27, 0.0 }
 0x167   :  { %130 = vadd.xlane.f32.xlu0 %v129_v29  ;;  %146 = vadd.xlane.f32.xlu1 %v145_v30 }
 0x1a4   :  { %v114_v31 = vpop.xlane.xlu1 %113 }
 0x1a5   :  { %v115_v32 = vadd.f32 8.0, %v114_v31 }
 0x1a7   :  { %341 = vrcp.f32 %v115_v32 }
 0x1b1   :  { %v342_v33 = vpop.eup %341 }
 0x1b2   :  { %v117_v34 = vmul.f32 %v342_v33, %v115_v32 }
 0x1b4   :  { %v118_v35 = vsub.f32 2.0, %v117_v34 }
 0x1b6   :  { %v119_v36 = vmul.f32 %v342_v33, %v118_v35 }
 0x1b8   :  { %v120_v37 = vmul.f32 %v119_v36, %v115_v32 }
 0x1ba   :  { %v121_v38 = vsub.f32 2.0, %v120_v37 }
 0x1bc   :  { %v122_v39 = vmul.f32 %v121_v38, %v119_v36 }
 0x1be   :  { %v123_v40 = vmul.f32 %v122_v39, %v447_v25  ;;  %v124_v62 = vmul.f32 8.0, %v122_v39 }
 0x1c0   :  { %v158_v41 = vsel %vm111_vm2, %v123_v40, 0.0 }
 0x1c1   :  { %159 = vadd.xlane.f32.xlu1 %v158_v41 }
 0x1f4   :  { %v131_v42 = vpop.xlane.xlu0 %130  ;;  %v147_v43 = vpop.xlane.xlu1 %146 }
 0x1f5   :  { %v132_v44 = vadd.f32 8.0, %v131_v42  ;;  %v148_v45 = vadd.f32 8.0, %v147_v43 }
 0x1f7   :  { %343 = vrcp.f32 %v132_v44 }
 0x1f8   :  { %345 = vrcp.f32 %v148_v45 }
 0x201   :  { %v344_v46 = vpop.eup %343 }
 0x202   :  { %v346_v47 = vpop.eup %345  ;;  %v134_v48 = vmul.f32 %v344_v46, %v132_v44 }
 0x203   :  { %v150_v49 = vmul.f32 %v346_v47, %v148_v45 }
 0x204   :  { %v135_v50 = vsub.f32 2.0, %v134_v48 }
 0x205   :  { %v151_v51 = vsub.f32 2.0, %v150_v49 }
 0x206   :  { %v136_v52 = vmul.f32 %v344_v46, %v135_v50 }
 0x207   :  { %v152_v53 = vmul.f32 %v346_v47, %v151_v51 }
 0x208   :  { %v137_v54 = vmul.f32 %v136_v52, %v132_v44 }
 0x209   :  { %v153_v55 = vmul.f32 %v152_v53, %v148_v45 }
 0x20a   :  { %v138_v56 = vsub.f32 2.0, %v137_v54 }
 0x20b   :  { %v154_v57 = vsub.f32 2.0, %v153_v55 }
 0x20c   :  { %v139_v58 = vmul.f32 %v138_v56, %v136_v52 }
 0x20d   :  { %v155_v61 = vmul.f32 %v154_v57, %v152_v53 }
 0x20e   :  { %v140_v59 = vmul.f32 %v139_v58, %v447_v25  ;;  %v141_v60 = vmul.f32 8.0, %v139_v58 }
 0x20f   :  { %v156_v2 = vmul.f32 %v155_v61, %v447_v25  ;;  %v157_v28 = vmul.f32 8.0, %v155_v61 }
 0x210   :  { %162 = vrot.lane.b32.xlu0 %v140_v59, %s381_s13  ;;  %v184_v63 = vmul.f32 %v140_v59, %v124_v62  ;;  %v191_v0 = vmul.f32 %v141_v60, %v124_v62  ;;  %v239_v1 = vsel %vm238_vm3, %v124_v62, %v141_v60  ;;  %v182_v6 = vmul.f32 %v141_v60, %v123_v40 }
 0x211   :  { %v241_v36 = vsel %vm240_vm4, %v239_v1, %v157_v28  ;;  %v110_v1 = vadd.f32 1.0, %v447_v25 }
 0x214   :  { %197 = vrot.lane.b32.xlu0 %v156_v2, %s380_s1 }
 0x24e   :  { %v160_v11 = vpop.xlane.xlu1 %159 }
 0x282   :  { %v163_v3 = vpop.permute.xlu0 %162 }
 0x283   :  { %v169_v4 = vmul.f32 %v163_v3, %v123_v40  ;;  %v165_v5 = vsel %vm111_vm2, %v163_v3, 0.0 }
 0x284   :  { %166 = vadd.xlane.f32.xlu1 %v165_v5 }
 0x285   :  { %v183_v7 = vadd.f32 %v182_v6, %v169_v4  ;;  %v170_v8 = vsel %vm111_vm2, %v169_v4, 0.0 }
 0x286   :  { %v198_v9 = vpop.permute.xlu0 %197 }
 0x287   :  { %v200_v10 = vsel %vm111_vm2, %v198_v9, 0.0 }
 0x288   :  { %171 = vadd.xlane.f32.xlu1 %v170_v8 }
 0x299   :  { %186 = vrot.lane.b32.xlu1 %v184_v63, %s381_s13 }
 0x2bd   :  { %201 = vadd.xlane.f32.xlu1 %v200_v10 }
 0x311   :  { %v167_v12 = vpop.xlane.xlu1 %166 }
 0x312   :  { %v168_v13 = vmul.f32 %v167_v12, %v160_v11 }
 0x315   :  { %v172_v14 = vpop.xlane.xlu1 %171 }
 0x316   :  { %v173_v15 = vsub.f32 %v168_v13, %v172_v14 }
 0x318   :  { %v174_v16 = vsub.f32 1.0, %v173_v15 }
 0x319   :  { %v187_v22 = vpop.permute.xlu1 %186 }
 0x31a   :  { %347 = vrcp.f32 %v174_v16  ;;  %v189_v26 = vadd.f32 %v187_v22, %v183_v7 }
 0x324   :  { %v348_v17 = vpop.eup %347 }
 0x325   :  { %v176_v18 = vmul.f32 %v348_v17, %v174_v16 }
 0x327   :  { %v177_v19 = vsub.f32 2.0, %v176_v18 }
 0x329   :  { %v178_v20 = vmul.f32 %v348_v17, %v177_v19 }
 0x32b   :  { %v179_v21 = vmul.f32 %v178_v20, %v174_v16 }
 0x32d   :  { %v180_v23 = vsub.f32 2.0, %v179_v21 }
 0x32f   :  { %v181_v24 = vmul.f32 %v180_v23, %v178_v20 }
 0x331   :  { %v190_v27 = vmul.f32 %v189_v26, %v181_v24  ;;  %v192_v34 = vmul.f32 %v191_v0, %v181_v24 }
 0x333   :  { %v193_v29 = vsel %vm111_vm2, %v190_v27, 0.0  ;;  %v204_v30 = vmul.f32 %v198_v9, %v190_v27  ;;  %v217_v31 = vmul.f32 %v190_v27, %v157_v28  ;;  %v219_v35 = vmul.f32 %v192_v34, %v156_v2 }
 0x334   :  { %194 = vadd.xlane.f32.xlu0 %v193_v29  ;;  %v226_v49 = vmul.f32 %v192_v34, %v157_v28 }
 0x335   :  { %v218_v32 = vadd.f32 %v217_v31, %v204_v30  ;;  %v205_v33 = vsel %vm111_vm2, %v204_v30, 0.0 }
 0x338   :  { %206 = vadd.xlane.f32.xlu0 %v205_v33 }
 0x34a   :  { %v202_v38 = vpop.xlane.xlu1 %201 }
 0x34e   :  { %221 = vrot.lane.b32.xlu0 %v219_v35, %s380_s1 }
 0x352   :  { %247 = vrot.lane.b32.xlu0 %v241_v36, %s382_s0 }
 0x3c1   :  { %v195_v37 = vpop.xlane.xlu0 %194 }
 0x3c2   :  { %v203_v39 = vmul.f32 %v202_v38, %v195_v37 }
 0x3c5   :  { %v207_v40 = vpop.xlane.xlu0 %206 }
 0x3c6   :  { %v208_v41 = vsub.f32 %v203_v39, %v207_v40 }
 0x3c8   :  { %v209_v42 = vsub.f32 1.0, %v208_v41 }
 0x3c9   :  { %v222_v57 = vpop.permute.xlu0 %221 }
 0x3ca   :  { %349 = vrcp.f32 %v209_v42  ;;  %v224_v59 = vadd.f32 %v222_v57, %v218_v32 }
 0x3cd   :  { %v248_v3 = vpop.permute.xlu0 %247 }
 0x3d4   :  { %v350_v43 = vpop.eup %349 }
 0x3d5   :  { %v211_v44 = vmul.f32 %v350_v43, %v209_v42 }
 0x3d7   :  { %v212_v45 = vsub.f32 2.0, %v211_v44 }
 0x3d9   :  { %v213_v46 = vmul.f32 %v350_v43, %v212_v45 }
 0x3db   :  { %v214_v47 = vmul.f32 %v213_v46, %v209_v42 }
 0x3dd   :  { %v215_v48 = vsub.f32 2.0, %v214_v47 }
 0x3df   :  { %v216_v50 = vmul.f32 %v215_v48, %v213_v46 }
 0x3e1   :  { %v227_v51 = vmul.f32 %v226_v49, %v216_v50  ;;  %v225_v61 = vmul.f32 %v224_v59, %v216_v50 }
 0x3e3   :  { %351 = vrcp.f32 %v227_v51 }
 0x3ed   :  { %v352_v52 = vpop.eup %351 }
 0x3ee   :  { %v229_v53 = vmul.f32 %v352_v52, %v227_v51 }
 0x3f0   :  { %v230_v54 = vsub.f32 2.0, %v229_v53 }
 0x3f2   :  { %v231_v55 = vmul.f32 %v352_v52, %v230_v54 }
 0x3f4   :  { %v232_v56 = vmul.f32 %v231_v55, %v227_v51 }
 0x3f6   :  { %v233_v58 = vsub.f32 2.0, %v232_v56 }
 0x3f8   :  { %v234_v60 = vmul.f32 %v233_v58, %v231_v55 }
 0x3fa   :  { %v235_v62 = vmul.f32 8.0, %v234_v60 }
 0x3fc   :  { %v236_v63 = vmul.f32 %v235_v62, %v225_v61 }
 0x3fe   :  { %v237_v0 = vadd.f32 1.0, %v236_v63 }
 0x400   :  { %243 = vrot.lane.b32.xlu1 %v237_v0, %s383_s2 }
 0x472   :  { %v244_v2 = vpop.permute.xlu1 %243 }
 0x473   :  { %v251_v4 = vsel %vm250_vm5, %v110_v1, %v244_v2 }
 0x474   :  { %v253_v5 = vsel %vm252_vm6, %v251_v4, %v248_v3 }
 0x475   :  { %v255_v6 = vsel %vm254_vm7, %v253_v5, %v227_v51 }
 0x476   :  { %v257_v7 = vsel %vm256_vm8, %v255_v6, 0.0 }
 0x477   :  { %258 = vst [vmem:[#allocation2] sm:$0xf] %v257_v7 }
 0x478   :  { %364 = shalt.err (!%p361_p4)
}
 0x479   :  { %s365_s19 = scalar_lea.hbm %s486_s3, 64 }
 0x47a   :  { %p366_p5 = scmp.ne.s32.totalorder %s486_s3, %s365_s19  ;;  %p369_p6 = scmp.lt.u32.totalorder %s365_s19, %s486_s3 }
 0x47c   :  { %p371_p7 = pnand %p369_p6, %p366_p5 }
 0x47e   :  { %374 = shalt.err (!%p371_p7)
}
 0x47f   :  { %268 = dma.vmem_to_hbm [thread:$0]  %s266_s15, 64, %s486_s3, [#allocation3]  }
 0x480   :  { %375 = dma.done.wait [#allocation3], 64  }
 0x481   :  { %376 = vsyncadd [#allocation3], 4294967232 }
 0x482   :  { %272 = vsyncpa [#allocation3], 1 }

</bundles_post_ra>
